<compile_context>
chip_gen: v5e
topology: v5e:2x2
jax: 0.10.0
libtpu: 0.0.40
codegen_flags: <defaults>
</compile_context>

<pallas_src>
import jax
import jax.numpy as jnp
from jax.experimental import pallas as pl
from jax.experimental.pallas import tpu as pltpu


def _round_up(v, m):
    return (v + m - 1) // m * m


def _pick_tile(n_pad, cap):
    """Largest multiple of 128 that divides n_pad and is <= cap (n_pad % 128 == 0)."""
    cap = max(128, min(cap, n_pad))
    cap -= cap % 128
    for cand in range(cap, 127, -128):
        if n_pad % cand == 0:
            return cand
    return 128


def _vmem_cap_bytes():
    """Generation-aware VMEM request cap: ~0.75 * physical (96 MiB on 128-MiB parts,
    48 MiB on v7x's 64 MiB per-TC). Conservative fallback if the query is unavailable."""
    try:
        info = pltpu.get_tpu_info()
        for attr in ("vmem_capacity_bytes", "vmem_size_bytes"):
            phys = getattr(info, attr, None)
            if phys:
                return int(phys) * 3 // 4
    except Exception:
        pass
    return 48 * 1024 * 1024


def graphconv_kernel(a_ref, y_ref, root_ref, o_ref):
    """One (row-tile i, reduction-tile k) grid step.

    a_ref    : (t_i, t_k)     int8  adjacency tile A[i-block, k-block] (dst, src)
    y_ref    : (t_k, dout_p)  bf16  pre-transformed features y = x @ W_rel (source rows)
    root_ref : (t_i, dout_p)  f32   precomputed root term x_i @ W_root + b
    o_ref    : (t_i, dout_p)  f32   lane-dense output tile; doubles as the accumulator
                                    (revisited across k, resident in VMEM)
    """
    k = pl.program_id(1)

    @pl.when(k == 0)
    def _init():
        # Seed the accumulator with the root + bias term; no separate epilogue add needed.
        o_ref[...] = root_ref[...]

    # int8 -> bf16 widen (VPU; free in a DMA-bound kernel), then MXU matmul, f32 accumulate.
    a = a_ref[...].astype(jnp.bfloat16)
    o_ref[...] += jnp.dot(a, y_ref[...], preferred_element_type=jnp.float32)


def graph_conv(x, edge_index, w_rel, w_root, bias):
    """x: (N, Din) f32; edge_index: (2, E) int32 with row0=src, row1=dst.
    Weights stored transposed vs. torch.nn.Linear: (Din, Dout); bias (Dout,).
    Precondition: parallel-edge multiplicity <= 127 (int8 adjacency stream);
    out-of-range edge indices are silently dropped by the JAX scatter."""
    n, din = x.shape
    dout = w_rel.shape[1]

    # ---- padding: N to a multiple of 128 (not of the tile), Dout lane-dense -------------
    n_pad = _round_up(n, 128)
    dout_p = _round_up(dout, 128)

    # ---- tiling: decoupled row tile / reduction tile -------------------------------------
    t_i = _pick_tile(n_pad, min(512, max(128, n_pad // 2)))   # >= 2 row tiles when possible
    t_k = _pick_tile(n_pad, 1024)

    cap_bytes = _vmem_cap_bytes()

    def _footprint(tk):
        return (2 * t_i * tk               # A tiles, int8, double-buffered
                + 2 * tk * dout_p * 2      # y tiles, bf16, double-buffered
                + 2 * t_i * dout_p * 4     # root tiles, f32, double-buffered
                + 2 * t_i * dout_p * 4)    # output/accumulator tiles, f32, double-buffered

    while _footprint(t_k) > cap_bytes // 2 and t_k > 128:
        t_k = _pick_tile(n_pad, t_k - 128)

    vmem_limit = min(max(2 * _footprint(t_k), 16 * 1024 * 1024), cap_bytes)

    # ---- glue (plain JAX): adjacency build + pre-transforms -------------------------------
    src, dst = edge_index[0], edge_index[1]
    # Integer-exact scatter-add, then cast so the kernel's dominant HBM stream is 1 B/elem.
    # (Building directly in int8 would also drop the 4-byte intermediate once narrow-dtype
    #  scatter support is universally solid on TPU.)
    adj = jnp.zeros((n_pad, n_pad), jnp.int32).at[dst, src].add(1).astype(jnp.int8)

    hp = jax.lax.Precision.HIGHEST
    x_pad = jnp.zeros((n_pad, din), jnp.float32).at[:n].set(x)
    w_rel_p = jnp.zeros((din, dout_p), jnp.float32).at[:, :dout].set(w_rel)
    w_root_p = jnp.zeros((din, dout_p), jnp.float32).at[:, :dout].set(w_root)
    b_p = jnp.zeros((dout_p,), jnp.float32).at[:dout].set(bias)

    # Pre-multiply: stream y = x @ W_rel (lane-dense), bf16 for the MXU.
    y = jnp.dot(x_pad, w_rel_p, precision=hp).astype(jnp.bfloat16)
    # Tiny root/bias GEMM precomputed in f32; seeds the in-kernel accumulator.
    root = jnp.dot(x_pad, w_root_p, precision=hp) + b_p[None, :]

    grid = (n_pad // t_i, n_pad // t_k)

    out = pl.pallas_call(
        graphconv_kernel,
        out_shape=jax.ShapeDtypeStruct((n_pad, dout_p), jnp.float32),
        grid_spec=pltpu.PrefetchScalarGridSpec(
            num_scalar_prefetch=0,
            grid=grid,
            in_specs=[
                pl.BlockSpec((t_i, t_k), lambda i, k: (i, k)),      # A tile (int8)
                pl.BlockSpec((t_k, dout_p), lambda i, k: (k, 0)),   # y tile (source rows)
                pl.BlockSpec((t_i, dout_p), lambda i, k: (i, 0)),   # root tile (dest rows)
            ],
            out_specs=pl.BlockSpec((t_i, dout_p), lambda i, k: (i, 0)),
        ),
        compiler_params=pltpu.CompilerParams(
            dimension_semantics=("parallel", "arbitrary"),
            vmem_limit_bytes=vmem_limit,
        ),
    )(adj, y, root)

    return out[:n, :dout]


def reference_graph_conv(x, edge_index, w_rel, w_root, bias):
    """f32 PyG GraphConv (aggr='add') reference with the kernel's stated precision
    contract: the relational stream y = x @ W_rel is rounded to bf16 before aggregation."""
    n = x.shape[0]
    src, dst = edge_index[0], edge_index[1]
    adj = jnp.zeros((n, n), jnp.float32).at[dst, src].add(1.0)
    hp = jax.lax.Precision.HIGHEST
    y = jnp.dot(x, w_rel, precision=hp).astype(jnp.bfloat16).astype(jnp.float32)
    return (jnp.dot(adj, y, precision=hp)
            + jnp.dot(x, w_root, precision=hp)
            + bias[None, :])


if __name__ == "__main__":
    key = jax.random.PRNGKey(0)
    k_x, k_e, k_wr, k_wo, k_b = jax.random.split(key, 5)

    N = 16        # number of nodes
    E = 48        # number of edges
    DIM_IN = 32   # layer_config.dim_in
    DIM_OUT = 32  # layer_config.dim_out

    x = jax.random.normal(k_x, (N, DIM_IN), dtype=jnp.float32)
    edge_index = jax.random.randint(k_e, (2, E), 0, N, dtype=jnp.int32)

    # Deterministic parameter init (synthetic, not a checkpoint load).
    scale = 1.0 / jnp.sqrt(jnp.float32(DIM_IN))
    w_rel = jax.random.uniform(k_wr, (DIM_IN, DIM_OUT), jnp.float32, -scale, scale)
    w_root = jax.random.uniform(k_wo, (DIM_IN, DIM_OUT), jnp.float32, -scale, scale)
    bias = jax.random.uniform(k_b, (DIM_OUT,), jnp.float32, -scale, scale)

    out = graph_conv(x, edge_index, w_rel, w_root, bias)
    out = jax.block_until_ready(out)

    ref = reference_graph_conv(x, edge_index, w_rel, w_root, bias)

    assert out.shape == (N, DIM_OUT)
    assert jnp.allclose(out, ref, atol=1e-3, rtol=1e-3), float(jnp.max(jnp.abs(out - ref)))

    print("KERNEL_OK")
</pallas_src>

<mosaic_0001>
module attributes {stable_mosaic.version = 11 : i64} {
  func.func @graphconv_kernel(%arg0: i32, %arg1: i32, %arg2: memref<128x128xi8, #tpu.memory_space<vmem>>, %arg3: memref<128x128xbf16, #tpu.memory_space<vmem>>, %arg4: memref<128x128xf32, #tpu.memory_space<vmem>>, %arg5: memref<128x128xf32, #tpu.memory_space<vmem>>) attributes {dimension_semantics = [#tpu.dimension_semantics<parallel>, #tpu.dimension_semantics<arbitrary>], iteration_bounds = array<i64: 1, 1>, scalar_prefetch = 0 : i64, scratch_operands = 0 : i64, tpu.core_type = #tpu.core_type<tc>, window_params = [{transform_indices = @transform_0, window_bounds = array<i64: 128, 128>}, {transform_indices = @transform_1, window_bounds = array<i64: 128, 128>}, {transform_indices = @transform_2, window_bounds = array<i64: 128, 128>}, {transform_indices = @transform_3, window_bounds = array<i64: 128, 128>}]} {
    %c0_i32 = arith.constant 0 : i32
    %0 = arith.cmpi eq, %arg1, %c0_i32 : i32
    %1 = arith.extui %0 : i1 to i32
    %c0_i32_0 = arith.constant 0 : i32
    %2 = arith.cmpi ne, %1, %c0_i32_0 : i32
    scf.if %2 {
      %c0_8 = arith.constant 0 : index
      %c0_9 = arith.constant 0 : index
      %10 = vector.load %arg4[%c0_8, %c0_9] : memref<128x128xf32, #tpu.memory_space<vmem>>, vector<128x128xf32>
      %c0_10 = arith.constant 0 : index
      %c0_11 = arith.constant 0 : index
      %11 = vector.load %arg5[%c0_10, %c0_11] : memref<128x128xf32, #tpu.memory_space<vmem>>, vector<128x128xf32>
      tpu.vector_store %arg5[%c0_10, %c0_11], %10 {strides = array<i32>} : memref<128x128xf32, #tpu.memory_space<vmem>>, vector<128x128xf32>,
    } else {
    }
    %c0 = arith.constant 0 : index
    %c0_1 = arith.constant 0 : index
    %3 = vector.load %arg2[%c0, %c0_1] : memref<128x128xi8, #tpu.memory_space<vmem>>, vector<128x128xi8>
    %4 = arith.sitofp %3 : vector<128x128xi8> to vector<128x128xbf16>
    %c0_2 = arith.constant 0 : index
    %c0_3 = arith.constant 0 : index
    %5 = vector.load %arg5[%c0_2, %c0_3] : memref<128x128xf32, #tpu.memory_space<vmem>>, vector<128x128xf32>
    %c0_4 = arith.constant 0 : index
    %c0_5 = arith.constant 0 : index
    %6 = vector.load %arg3[%c0_4, %c0_5] : memref<128x128xbf16, #tpu.memory_space<vmem>>, vector<128x128xbf16>
    %cst = arith.constant dense<0.000000e+00> : vector<128x128xf32>
    %7 = tpu.matmul %4, %6, %cst {dimension_numbers = #tpu.dot_dimension_numbers<[1], [0], [0], [1], [0, 0, 1, 1], [], []>} : vector<128x128xbf16>, vector<128x128xbf16>, vector<128x128xf32> -> vector<128x128xf32>
    %8 = arith.addf %5, %7 : vector<128x128xf32>
    %c0_6 = arith.constant 0 : index
    %c0_7 = arith.constant 0 : index
    %9 = vector.load %arg5[%c0_6, %c0_7] : memref<128x128xf32, #tpu.memory_space<vmem>>, vector<128x128xf32>
    tpu.vector_store %arg5[%c0_6, %c0_7], %8 {strides = array<i32>} : memref<128x128xf32, #tpu.memory_space<vmem>>, vector<128x128xf32>,
    return
  }
  func.func @transform_0(%arg0: i32, %arg1: i32) -> (i32, i32) {
    %c0_i32 = arith.constant 0 : i32
    return %arg0, %arg1 : i32, i32
  }
  func.func @transform_1(%arg0: i32, %arg1: i32) -> (i32, i32) {
    %c0_i32 = arith.constant 0 : i32
    %c0_i32_0 = arith.constant 0 : i32
    return %arg1, %c0_i32 : i32, i32
  }
  func.func @transform_2(%arg0: i32, %arg1: i32) -> (i32, i32) {
    %c0_i32 = arith.constant 0 : i32
    %c0_i32_0 = arith.constant 0 : i32
    return %arg0, %c0_i32 : i32, i32
  }
  func.func @transform_3(%arg0: i32, %arg1: i32) -> (i32, i32) {
    %c0_i32 = arith.constant 0 : i32
    %c0_i32_0 = arith.constant 0 : i32
    return %arg0, %c0_i32 : i32, i32
  }
}

</mosaic_0001>

<bundles_post_ra>
// kernel: tpu_custom_call.1
= control target key start
LH: loop header
LB: loop body
LE: loop exit
PB: predicated region body
PF: predicated region fallthrough
CT: control target
= control target key end

     0   :  { %8 = vsyncpa [#allocation3], 0  ;;  %s546_s0 = inlined_call_operand.hbm [shape: s8[128,128], index: 0, kind: input, shape index: {}]   ;;  %s547_s1 = inlined_call_operand.hbm [shape: bf16[128,128], index: 1, kind: input, shape index: {}]   ;;  %s548_s2 = inlined_call_operand.hbm [shape: f32[128,128], index: 2, kind: input, shape index: {}]   ;;  %s549_s3 = inlined_call_operand.hbm [shape: f32[128,128], index: 3, kind: output, shape index: {}]  }
   0x1   :  { %9 = vsyncpa [#allocation6], 0  ;;  %s28_s14 = sshll.u32 %s547_s1, 4  ;;  %s29_s14 = int_to_ptr.hbm [resolvable:$true] %s28_s14 }
   0x2   :  { %10 = vsyncpa [#allocation4], 0  ;;  %s497_s15 = smov [#allocation5]   ;;  %s15_s19 = sshll.u32 %s546_s0, 4  ;;  %s16_s19 = int_to_ptr.hbm [resolvable:$true] %s15_s19 }
   0x3   :  { %s30_s16 = sshll.u32 %s497_s15, 4  ;;  %s498_s20 = smov 64   ;;  %s31_s16 = int_to_ptr.vmem [resolvable:$true] %s30_s16 }
   0x4   :  { %s499_s21 = smov 4   ;;  %s500_s22 = smov [#allocation2]  }
   0x5   :  { %36 = dma.hbm_to_vmem [thread:$0]  %s29_s14, 1024, %s31_s16, [#allocation6], %s498_s20, %s498_s20, %s499_s21  }
   0x6   :  { %s17_s23 = sshll.u32 %s500_s22, 4  ;;  %s501_s24 = smov 128   ;;  %s18_s23 = int_to_ptr.vmem [resolvable:$true] %s17_s23 }
   0x7   :  { %s502_s25 = smov 8   ;;  %s41_s27 = sshll.u32 %s548_s2, 4  ;;  %s42_s27 = int_to_ptr.hbm [resolvable:$true] %s41_s27 }
   0x8   :  { %23 = dma.hbm_to_vmem [thread:$0]  %s16_s19, 512, %s18_s23, [#allocation3], %s501_s24, %s501_s24, %s502_s25  }
   0x9   :  { %s503_s28 = smov [#allocation7]  }
   0xa   :  { %s43_s0 = sshll.u32 %s503_s28, 4  ;;  %s44_s0 = int_to_ptr.vmem [resolvable:$true] %s43_s0 }
   0xb   :  { %49 = dma.hbm_to_vmem [thread:$0]  %s42_s27, 2048, %s44_s0, [#allocation6], %s501_s24, %s501_s24, %s502_s25  }
   0xc   :  { %491 = dma.done.wait [#allocation3], 512  }
   0xd   :  { %492 = vsyncadd [#allocation3], 4294966784 }
   0xe   :  { %493 = dma.done.wait [#allocation6], 3072  }
   0xf   :  { %494 = vsyncadd [#allocation6], 4294964224  ;;  %v362_v0 = vld [vmem:[#allocation5 + $0x38] sm:$0xff]  ;;  %v361_v1 = vld [vmem:[#allocation5 + $0x30] sm:$0xff]  ;;  %s504_s2 = smov [#allocation8]   ;;  %s309_s5 = sshll.u32 %s549_s3, 4  ;;  %s310_s5 = int_to_ptr.hbm [resolvable:$true] %s309_s5 }
  0x10   :  { %222 = vmatpush.bf16.msra.mxu0 %v362_v0  ;;  %363 = vmatpush.bf16.msra.mxu1 %v362_v0  ;;  %v360_v2 = vld [vmem:[#allocation5 + $0x28] sm:$0xff]  ;;  %v359_v3 = vld [vmem:[#allocation5 + $0x20] sm:$0xff]  ;;  %v358_v4 = vld [vmem:[#allocation5 + $0x18] sm:$0xff]  ;;  %s307_s29 = sshll.u32 %s504_s2, 4  ;;  %s308_s29 = int_to_ptr.vmem [resolvable:$true] %s307_s29 }
  0x11   :  { %364 = vmatpush.bf16.msra.mxu2 %v362_v0  ;;  %365 = vmatpush.bf16.msra.mxu3 %v362_v0  ;;  %v357_v5 = vld [vmem:[#allocation5 + $0x10] sm:$0xff]  ;;  %v98_v6 = vld [vmem:[#allocation2] sm:$0xff]  ;;  %v99_v7 = vld [vmem:[#allocation2 + $0x8] sm:$0xff] }
  0x12   :  { %v100_v8 = vld [vmem:[#allocation2 + $0x10] sm:$0xff]  ;;  %v101_v9 = vld [vmem:[#allocation2 + $0x18] sm:$0xff]  ;;  %v102_v10 = vunpack.c.0.s8 %v98_v6  ;;  %v103_v11 = vunpack.c.1.s8 %v98_v6  ;;  %v106_v12 = vunpack.c.0.s8 %v99_v7  ;;  %v107_v13 = vunpack.c.1.s8 %v99_v7  ;;  %v356_v14 = vld [vmem:[#allocation5 + $0x8] sm:$0xff] }
  0x13   :  { %v110_v15 = vunpack.c.0.s8 %v100_v8  ;;  %v111_v16 = vunpack.c.1.s8 %v100_v8  ;;  %v114_v17 = vunpack.c.0.s8 %v101_v9  ;;  %v115_v18 = vunpack.c.1.s8 %v101_v9  ;;  %v355_v23 = vld [vmem:[#allocation5] sm:$0xff]  ;;  %v67_v60 = vld [vmem:[#allocation7 + $0x8] sm:$0xff] }
  0x14   :  { %223 = vmatpush.bf16.msra.mxu0 %v361_v1  ;;  %366 = vmatpush.bf16.msra.mxu1 %v361_v1  ;;  %v118_v19 = vcvt.s32.f32 %v102_v10  ;;  %v119_v20 = vcvt.s32.f32 %v103_v11  ;;  %v122_v21 = vcvt.s32.f32 %v106_v12  ;;  %v123_v22 = vcvt.s32.f32 %v107_v13  ;;  %v66_v52 = vld [vmem:[#allocation7] sm:$0xff]  ;;  %v71_v61 = vld [vmem:[#allocation7 + $0x28] sm:$0xff] }
  0x15   :  { %367 = vmatpush.bf16.msra.mxu2 %v361_v1  ;;  %368 = vmatpush.bf16.msra.mxu3 %v361_v1  ;;  %v126_v24 = vcvt.s32.f32 %v110_v15  ;;  %v127_v25 = vcvt.s32.f32 %v111_v16  ;;  %v130_v26 = vcvt.s32.f32 %v114_v17  ;;  %v131_v27 = vcvt.s32.f32 %v115_v18  ;;  %v70_v53 = vld [vmem:[#allocation7 + $0x20] sm:$0xff]  ;;  %v76_v18 = vld [vmem:[#allocation7 + $0x50] sm:$0xff] }
  0x16   :  { %v134_v28 = vpack.c.bf16 %v119_v20, %v118_v19  ;;  %v136_v29 = vpack.c.bf16 %v123_v22, %v122_v21  ;;  %v104_v32 = vunpack.c.2.s8 %v98_v6  ;;  %v105_v33 = vunpack.c.3.s8 %v98_v6  ;;  %v74_v58 = vld [vmem:[#allocation7 + $0x40] sm:$0xff]  ;;  %v75_v6 = vld [vmem:[#allocation7 + $0x48] sm:$0xff]  ;;  %v80_v19 = vld [vmem:[#allocation7 + $0x70] sm:$0xff] }
  0x17   :  { %v138_v30 = vpack.c.bf16 %v127_v25, %v126_v24  ;;  %v140_v31 = vpack.c.bf16 %v131_v27, %v130_v26  ;;  %v108_v34 = vunpack.c.2.s8 %v99_v7  ;;  %v109_v35 = vunpack.c.3.s8 %v99_v7  ;;  %v78_v59 = vld [vmem:[#allocation7 + $0x60] sm:$0xff]  ;;  %v79_v7 = vld [vmem:[#allocation7 + $0x68] sm:$0xff]  ;;  %v69_v20 = vld [vmem:[#allocation7 + $0x18] sm:$0xff] }
  0x18   :  { %224 = vmatpush.bf16.msra.mxu0 %v360_v2  ;;  %369 = vmatpush.bf16.msra.mxu1 %v360_v2  ;;  %v112_v36 = vunpack.c.2.s8 %v100_v8  ;;  %v113_v37 = vunpack.c.3.s8 %v100_v8  ;;  %v116_v38 = vunpack.c.2.s8 %v101_v9  ;;  %v117_v39 = vunpack.c.3.s8 %v101_v9  ;;  %v68_v8 = vld [vmem:[#allocation7 + $0x10] sm:$0xff]  ;;  %v73_v21 = vld [vmem:[#allocation7 + $0x38] sm:$0xff] }
  0x19   :  { %370 = vmatpush.bf16.msra.mxu2 %v360_v2  ;;  %371 = vmatpush.bf16.msra.mxu3 %v360_v2  ;;  %v120_v40 = vcvt.s32.f32 %v104_v32  ;;  %v121_v41 = vcvt.s32.f32 %v105_v33  ;;  %v124_v42 = vcvt.s32.f32 %v108_v34  ;;  %v125_v43 = vcvt.s32.f32 %v109_v35  ;;  %v72_v9 = vld [vmem:[#allocation7 + $0x30] sm:$0xff] }
  0x1a   :  { %v128_v44 = vcvt.s32.f32 %v112_v36  ;;  %v129_v45 = vcvt.s32.f32 %v113_v37  ;;  %v132_v46 = vcvt.s32.f32 %v116_v38  ;;  %v133_v47 = vcvt.s32.f32 %v117_v39 }
  0x1b   :  { %v135_v48 = vpack.c.bf16 %v121_v41, %v120_v40  ;;  %v137_v49 = vpack.c.bf16 %v125_v43, %v124_v42 }
  0x1c   :  { %225 = vmatpush.bf16.msra.mxu0 %v359_v3  ;;  %372 = vmatpush.bf16.msra.mxu1 %v359_v3  ;;  %v139_v50 = vpack.c.bf16 %v129_v45, %v128_v44  ;;  %v141_v51 = vpack.c.bf16 %v133_v47, %v132_v46 }
  0x1d   :  { %373 = vmatpush.bf16.msra.mxu2 %v359_v3  ;;  %374 = vmatpush.bf16.msra.mxu3 %v359_v3 }
  0x20   :  { %226 = vmatpush.bf16.msra.mxu0 %v358_v4  ;;  %375 = vmatpush.bf16.msra.mxu1 %v358_v4 }
  0x21   :  { %376 = vmatpush.bf16.msra.mxu2 %v358_v4  ;;  %377 = vmatpush.bf16.msra.mxu3 %v358_v4 }
  0x24   :  { %227 = vmatpush.bf16.msra.mxu0 %v357_v5  ;;  %378 = vmatpush.bf16.msra.mxu1 %v357_v5 }
  0x25   :  { %379 = vmatpush.bf16.msra.mxu2 %v357_v5  ;;  %380 = vmatpush.bf16.msra.mxu3 %v357_v5 }
  0x28   :  { %228 = vmatpush.bf16.msra.mxu0 %v356_v14  ;;  %381 = vmatpush.bf16.msra.mxu1 %v356_v14 }
  0x29   :  { %382 = vmatpush.bf16.msra.mxu2 %v356_v14  ;;  %383 = vmatpush.bf16.msra.mxu3 %v356_v14 }
  0x2c   :  { %229 = vmatpush.bf16.msra.mxu0 %v355_v23  ;;  %384 = vmatpush.bf16.msra.mxu1 %v355_v23 }
  0x2d   :  { %385 = vmatpush.bf16.msra.mxu2 %v355_v23  ;;  %386 = vmatpush.bf16.msra.mxu3 %v355_v23 }
  0x2f   :  { %230 = vmatmul.bf16.vlgmr.msra.gmra.mxu0 %v134_v28  ;;  %240 = vmatmul.bf16.vlgmr.msra.gmra.mxu1 %v136_v29 }
  0x30   :  { %250 = vmatmul.bf16.vlgmr.msra.gmra.mxu2 %v138_v30  ;;  %260 = vmatmul.bf16.vlgmr.msra.gmra.mxu3 %v140_v31  ;;  %v77_v30 = vld [vmem:[#allocation7 + $0x58] sm:$0xff] }
  0x31   :  { %v81_v31 = vld [vmem:[#allocation7 + $0x78] sm:$0xff] }
  0x3f   :  { %235 = vmatmul.bf16.gmra.mxu0 %v135_v48  ;;  %245 = vmatmul.bf16.gmra.mxu1 %v137_v49 }
  0x40   :  { %255 = vmatmul.bf16.gmra.mxu2 %v139_v50  ;;  %265 = vmatmul.bf16.gmra.mxu3 %v141_v51 }
  0xac   :  { %v231_v54 = vpop.f32.mrf.mxu0  ;;  %v241_v55 = vpop.f32.mrf.mxu1 }
  0xad   :  { %v271_v56 = vadd.f32 %v231_v54, %v66_v52  ;;  %v275_v57 = vadd.f32 %v241_v55, %v70_v53 }
  0xaf   :  { %287 = vst [vmem:[#allocation8] sm:$0xff] %v271_v56 }
  0xb0   :  { %291 = vst [vmem:[#allocation8 + $0x20] sm:$0xff] %v275_v57 }
  0xb3   :  { %v251_v62 = vpop.f32.mrf.mxu2  ;;  %v261_v63 = vpop.f32.mrf.mxu3 }
  0xb4   :  { %v279_v0 = vadd.f32 %v251_v62, %v74_v58  ;;  %v283_v1 = vadd.f32 %v261_v63, %v78_v59  ;;  %v233_v2 = vpop.f32.mrf.mxu0  ;;  %v243_v3 = vpop.f32.mrf.mxu1 }
  0xb5   :  { %v272_v4 = vadd.f32 %v233_v2, %v67_v60  ;;  %v276_v5 = vadd.f32 %v243_v3, %v71_v61 }
  0xb6   :  { %295 = vst [vmem:[#allocation8 + $0x40] sm:$0xff] %v279_v0 }
  0xb7   :  { %299 = vst [vmem:[#allocation8 + $0x60] sm:$0xff] %v283_v1 }
  0xb8   :  { %288 = vst [vmem:[#allocation8 + $0x8] sm:$0xff] %v272_v4 }
  0xb9   :  { %292 = vst [vmem:[#allocation8 + $0x28] sm:$0xff] %v276_v5 }
  0xbb   :  { %v253_v10 = vpop.f32.mrf.mxu2  ;;  %v263_v11 = vpop.f32.mrf.mxu3 }
  0xbc   :  { %v280_v12 = vadd.f32 %v253_v10, %v75_v6  ;;  %v284_v13 = vadd.f32 %v263_v11, %v79_v7  ;;  %v236_v14 = vpop.f32.mrf.mxu0  ;;  %v246_v15 = vpop.f32.mrf.mxu1 }
  0xbd   :  { %v273_v16 = vadd.f32 %v236_v14, %v68_v8  ;;  %v277_v17 = vadd.f32 %v246_v15, %v72_v9 }
  0xbe   :  { %296 = vst [vmem:[#allocation8 + $0x48] sm:$0xff] %v280_v12 }
  0xbf   :  { %300 = vst [vmem:[#allocation8 + $0x68] sm:$0xff] %v284_v13 }
  0xc0   :  { %289 = vst [vmem:[#allocation8 + $0x10] sm:$0xff] %v273_v16 }
  0xc1   :  { %293 = vst [vmem:[#allocation8 + $0x30] sm:$0xff] %v277_v17 }
  0xc3   :  { %v256_v22 = vpop.f32.mrf.mxu2  ;;  %v266_v23 = vpop.f32.mrf.mxu3 }
  0xc4   :  { %v281_v24 = vadd.f32 %v256_v22, %v76_v18  ;;  %v285_v25 = vadd.f32 %v266_v23, %v80_v19  ;;  %v238_v26 = vpop.f32.mrf.mxu0  ;;  %v248_v27 = vpop.f32.mrf.mxu1 }
  0xc5   :  { %v274_v28 = vadd.f32 %v238_v26, %v69_v20  ;;  %v278_v29 = vadd.f32 %v248_v27, %v73_v21 }
  0xc6   :  { %297 = vst [vmem:[#allocation8 + $0x50] sm:$0xff] %v281_v24 }
  0xc7   :  { %301 = vst [vmem:[#allocation8 + $0x70] sm:$0xff] %v285_v25 }
  0xc8   :  { %290 = vst [vmem:[#allocation8 + $0x18] sm:$0xff] %v274_v28 }
  0xc9   :  { %294 = vst [vmem:[#allocation8 + $0x38] sm:$0xff] %v278_v29 }
  0xcb   :  { %v258_v32 = vpop.f32.mrf.mxu2  ;;  %v268_v33 = vpop.f32.mrf.mxu3 }
  0xcc   :  { %v282_v34 = vadd.f32 %v258_v32, %v77_v30  ;;  %v286_v35 = vadd.f32 %v268_v33, %v81_v31 }
  0xce   :  { %298 = vst [vmem:[#allocation8 + $0x58] sm:$0xff] %v282_v34 }
  0xcf   :  { %302 = vst [vmem:[#allocation8 + $0x78] sm:$0xff] %v286_v35 }
  0xd0   :  { %315 = dma.vmem_to_hbm [thread:$0]  %s308_s29, 2048, %s310_s5, [#allocation4], %s501_s24, %s501_s24, %s502_s25  }
  0xd1   :  { %495 = dma.done.wait [#allocation4], 2048  }
  0xd2   :  { %496 = vsyncadd [#allocation4], 4294965248 }
  0xd3   :  { %320 = vsyncpa [#allocation3], 1 }
  0xd4   :  { %321 = vsyncpa [#allocation6], 1 }
  0xd5   :  { %322 = vsyncpa [#allocation4], 1 }

</bundles_post_ra>
